<compile_context>
chip_gen: v7x
topology: tpu7x:2x2x1
jax: 0.10.0
libtpu: 0.0.40
codegen_flags: <defaults>
</compile_context>

<pallas_src>
import numpy as np
import jax
import jax.numpy as jnp
from jax.experimental import pallas as pl
from jax.experimental.pallas import tpu as pltpu


def _round_up(x, m):
    return ((x + m - 1) // m) * m


def facts_converter_kernel(z_ref, q_ref, a_ref, mb_ref, v_ref):
    """One (batch-tile, atom-block) per grid step.

    z_ref  : (TILE_B, E, D)        object-centric features (storage dtype)
    q_ref  : (TILE_B, D)           query embedding (storage dtype)
    a_ref  : (D_rows, N_BLK) bf16  pre-transposed, pre-scattered atom embeddings
    mb_ref : (2, N_BLK) f32        row 0 = np-atom mask, row 1 = init/bk bias
    v_ref  : (TILE_B, N_BLK) f32   output valuation tile
    """
    tb, e, d = z_ref.shape
    n_blk = a_ref.shape[1]

    # Elementwise math in f32 (v5e has no bf16 VPU/EUP path).
    z = z_ref[...].astype(jnp.float32)            # (TB, E, D)
    q = q_ref[...].astype(jnp.float32)            # (TB, D)

    # Query-modulated object features; cast to bf16 only for the MXU operands.
    mod = (z * q[:, None, :]).astype(jnp.bfloat16)

    a = a_ref[...]                                # bf16 weights
    if a.shape[0] != d:                           # static; only when D % 8 != 0
        a = a[:d, :]

    # Single MXU matmul: (TB*E, D) @ (D, N_BLK), f32 accumulation.
    logits = jnp.dot(mod.reshape(tb * e, d), a,
                     preferred_element_type=jnp.float32)

    # Aggregate over entities and squash -> vm(Z, Q, atom_j).
    scores = jax.nn.sigmoid(jnp.max(logits.reshape(tb, e, n_blk), axis=1))

    # Scatter-as-mask + init/bk bias epilogue (VPU, lane-dense store).
    mb = mb_ref[...]
    v_ref[...] = mb[0:1, :] * scores + mb[1:2, :]


def build_dense_params(atom_emb, np_indices, bk_indices, n_atoms):
    """Encode the convert() index loops as dense, lane-padded constants."""
    n_np, d = atom_emb.shape
    d_rows = _round_up(d, 8)                  # sublane-aligned weight rows
    n_pad = _round_up(n_atoms, 128)           # lane-dense atom axis

    a_full = np.zeros((d_rows, n_pad), np.float32)
    a_full[:d, np.asarray(np_indices)] = np.asarray(atom_emb, np.float32).T

    np_mask = np.zeros((n_pad,), np.float32)
    np_mask[np.asarray(np_indices)] = 1.0

    init_vec = np.zeros((n_pad,), np.float32)
    init_vec[0] = 1.0
    bk_vec = np.zeros((n_pad,), np.float32)
    for i in bk_indices:
        bk_vec[i] += 1.0

    # assignment semantics for np atoms (overrides init), then +1 bk additions
    bias = init_vec * (1.0 - np_mask) + bk_vec
    mask_bias = np.stack([np_mask, bias], axis=0)        # (2, n_pad)

    return jnp.asarray(a_full, jnp.bfloat16), jnp.asarray(mask_bias, jnp.float32)


def facts_converter(Z, Q, a_full, mask_bias, n_atoms):
    B, E, D = Z.shape
    d_rows, n_pad = a_full.shape

    # Atom (lane) axis blocking: bounds the logits intermediate / A slab for
    # large n_atoms and gives extra parallel grid steps.
    n_blk = min(n_pad, 2048)
    grid_n = pl.cdiv(n_pad, n_blk)

    # Batch tile: large enough to amortize per-step overhead and fill the MXU
    # (tile_b * E >= 256), small enough that the (tile_b*E, n_blk) logits
    # intermediate stays a few MiB.  For tiny batches use a single full block
    # (no padding, no masked tail).
    if B <= 8:
        tile_b = B
    else:
        itemsize = Z.dtype.itemsize
        tb_mxu = _round_up(-(-256 // max(E, 1)), 8)
        tb_dma = max(8, (2 * 1024 * 1024) // max(E * D * itemsize, 1))
        tb_logits = max(8, (8 * 1024 * 1024) // max(E * n_blk * 4, 1))
        tile_b = max(tb_mxu, min(tb_dma, tb_logits, 1024))
        tile_b = _round_up(min(tile_b, B), 8)
        # Keep >=2 batch steps so ("parallel", ...) can shard across v7x's 2 TCs.
        if pl.cdiv(B, tile_b) < 2 and B >= 16:
            tile_b = _round_up(pl.cdiv(B, 2), 8)
    grid_b = pl.cdiv(B, tile_b)

    # VMEM budget from actual tile sizes (double-buffered blocks + logits).
    tile_bytes = (tile_b * E * D * Z.dtype.itemsize
                  + tile_b * D * Q.dtype.itemsize
                  + d_rows * n_blk * 2          # bf16 A block
                  + 2 * n_blk * 4               # mask/bias block
                  + tile_b * n_blk * 4)         # output block
    logits_bytes = tile_b * E * n_blk * 4
    vmem_limit = int(min(max(2 * (2 * tile_bytes + logits_bytes), 16 << 20),
                         64 << 20))

    v_full = pl.pallas_call(
        facts_converter_kernel,
        out_shape=jax.ShapeDtypeStruct((B, n_pad), jnp.float32),
        grid_spec=pl.GridSpec(
            grid=(grid_b, grid_n),
            in_specs=[
                pl.BlockSpec((tile_b, E, D), lambda i, j: (i, 0, 0)),
                pl.BlockSpec((tile_b, D), lambda i, j: (i, 0)),
                pl.BlockSpec((d_rows, n_blk), lambda i, j: (0, j)),
                pl.BlockSpec((2, n_blk), lambda i, j: (0, j)),
            ],
            out_specs=pl.BlockSpec((tile_b, n_blk), lambda i, j: (i, j)),
        ),
        compiler_params=pltpu.CompilerParams(
            dimension_semantics=("parallel", "parallel"),
            vmem_limit_bytes=vmem_limit,
        ),
    )(Z, Q, a_full, mask_bias)

    # Strip atom-lane padding only (no batch padding was added).
    return v_full[:, :n_atoms]


def reference(Z, Q, atom_emb, np_indices, bk_indices, n_atoms):
    """Pure-numpy re-implementation of the PyTorch convert() loop."""
    B = Z.shape[0]
    V = np.zeros((B, n_atoms), dtype=np.float32)
    V[:, 0] = 1.0
    mod = np.asarray(Z, np.float32) * np.asarray(Q, np.float32)[:, None, :]
    logits = np.einsum("bed,nd->ben", mod, np.asarray(atom_emb, np.float32))
    scores = 1.0 / (1.0 + np.exp(-logits.max(axis=1)))       # (B, n_np)
    for j, i in enumerate(np_indices):
        V[:, i] = scores[:, j]                                # assignment
    for i in bk_indices:
        V[:, i] += 1.0                                        # bk addition
    return V


if __name__ == "__main__":
    # Small shapes consistent with the module:
    #   perception module: e entities, d feature dims; atoms list of size n_atoms.
    B, E, D = 2, 8, 32          # batch, entities, feature dim
    n_atoms = 24
    np_indices = [2, 3, 4, 5, 6, 7, 8, 9]     # neural-predicate atoms
    bk_indices = [10, 11, 12]                 # background-knowledge atoms
    n_np = len(np_indices)

    key = jax.random.PRNGKey(0)
    kz, kq, ka = jax.random.split(key, 3)
    Z = jax.random.normal(kz, (B, E, D), dtype=jnp.float32)
    Q = jax.random.normal(kq, (B, D), dtype=jnp.float32)
    # Deterministic synthetic valuation-module parameters (per-atom embeddings).
    atom_emb = 0.1 * jax.random.normal(ka, (n_np, D), dtype=jnp.float32)

    a_full, mask_bias = build_dense_params(
        atom_emb, np_indices, bk_indices, n_atoms)

    V = facts_converter(Z, Q, a_full, mask_bias, n_atoms)
    V = jax.block_until_ready(V)

    V_ref = reference(Z, Q, atom_emb, np_indices, bk_indices, n_atoms)
    # bf16 MXU operands (f32 accumulation) -> slightly looser tolerance vs f32 ref.
    assert np.allclose(np.asarray(V), V_ref, atol=2e-2, rtol=2e-2), (
        "mismatch vs reference")

    print("KERNEL_OK")
</pallas_src>

<mosaic_0001>
module attributes {stable_mosaic.version = 11 : i64} {
  func.func @facts_converter_kernel(%arg0: i32, %arg1: i32, %arg2: memref<2x8x32xf32, #tpu.memory_space<vmem>>, %arg3: memref<2x32xf32, #tpu.memory_space<vmem>>, %arg4: memref<32x128xbf16, #tpu.memory_space<vmem>>, %arg5: memref<2x128xf32, #tpu.memory_space<vmem>>, %arg6: memref<2x128xf32, #tpu.memory_space<vmem>>) attributes {dimension_semantics = [#tpu.dimension_semantics<parallel>, #tpu.dimension_semantics<parallel>], iteration_bounds = array<i64: 1, 1>, scalar_prefetch = 0 : i64, scratch_operands = 0 : i64, tpu.core_type = #tpu.core_type<tc>, window_params = [{transform_indices = @transform_0, window_bounds = array<i64: 2, 8, 32>}, {transform_indices = @transform_1, window_bounds = array<i64: 2, 32>}, {transform_indices = @transform_2, window_bounds = array<i64: 32, 128>}, {transform_indices = @transform_3, window_bounds = array<i64: 2, 128>}, {transform_indices = @transform_4, window_bounds = array<i64: 2, 128>}]} {
    %c0 = arith.constant 0 : index
    %c0_0 = arith.constant 0 : index
    %c0_1 = arith.constant 0 : index
    %0 = vector.load %arg2[%c0, %c0_0, %c0_1] : memref<2x8x32xf32, #tpu.memory_space<vmem>>, vector<2x8x32xf32>
    %c0_2 = arith.constant 0 : index
    %c0_3 = arith.constant 0 : index
    %1 = vector.load %arg3[%c0_2, %c0_3] : memref<2x32xf32, #tpu.memory_space<vmem>>, vector<2x32xf32>
    %2 = vector.shape_cast %1 : vector<2x32xf32> to vector<2x1x32xf32>
    %3 = vector.broadcast %2 : vector<2x1x32xf32> to vector<2x8x32xf32>
    %4 = arith.mulf %0, %3 : vector<2x8x32xf32>
    %5 = arith.truncf %4 : vector<2x8x32xf32> to vector<2x8x32xbf16>
    %c0_4 = arith.constant 0 : index
    %c0_5 = arith.constant 0 : index
    %6 = vector.load %arg4[%c0_4, %c0_5] : memref<32x128xbf16, #tpu.memory_space<vmem>>, vector<32x128xbf16>
    %7 = vector.shape_cast %5 : vector<2x8x32xbf16> to vector<16x32xbf16>
    %cst = arith.constant dense<0.000000e+00> : vector<16x128xf32>
    %8 = tpu.matmul %7, %6, %cst {dimension_numbers = #tpu.dot_dimension_numbers<[1], [0], [0], [1], [0, 0, 1, 1], [], []>} : vector<16x32xbf16>, vector<32x128xbf16>, vector<16x128xf32> -> vector<16x128xf32>
    %9 = vector.shape_cast %8 : vector<16x128xf32> to vector<2x8x128xf32>
    %cst_6 = arith.constant dense<0xFF800000> : vector<2x128xf32>
    %10 = vector.multi_reduction <maximumf>, %9, %cst_6 [1] : vector<2x8x128xf32> to vector<2x128xf32>
    %11 = arith.negf %10 : vector<2x128xf32>
    %12 = math.exp %11 : vector<2x128xf32>
    %cst_7 = arith.constant 1.000000e+00 : f32
    %13 = vector.broadcast %cst_7 : f32 to vector<2x128xf32>
    %14 = arith.addf %13, %12 : vector<2x128xf32>
    %15 = arith.divf %13, %14 : vector<2x128xf32>
    %c0_8 = arith.constant 0 : index
    %c0_9 = arith.constant 0 : index
    %16 = vector.load %arg5[%c0_8, %c0_9] : memref<2x128xf32, #tpu.memory_space<vmem>>, vector<2x128xf32>
    %17 = vector.extract_strided_slice %16 {offsets = [0, 0], sizes = [1, 128], strides = [1, 1]} : vector<2x128xf32> to vector<1x128xf32>
    %18 = vector.broadcast %17 : vector<1x128xf32> to vector<2x128xf32>
    %19 = arith.mulf %18, %15 : vector<2x128xf32>
    %20 = vector.extract_strided_slice %16 {offsets = [1, 0], sizes = [1, 128], strides = [1, 1]} : vector<2x128xf32> to vector<1x128xf32>
    %21 = vector.broadcast %20 : vector<1x128xf32> to vector<2x128xf32>
    %22 = arith.addf %19, %21 : vector<2x128xf32>
    %c0_10 = arith.constant 0 : index
    %c0_11 = arith.constant 0 : index
    %23 = vector.load %arg6[%c0_10, %c0_11] : memref<2x128xf32, #tpu.memory_space<vmem>>, vector<2x128xf32>
    tpu.vector_store %arg6[%c0_10, %c0_11], %22 {strides = array<i32>} : memref<2x128xf32, #tpu.memory_space<vmem>>, vector<2x128xf32>,
    return
  }
  func.func @transform_0(%arg0: i32, %arg1: i32) -> (i32, i32, i32) {
    %c0_i32 = arith.constant 0 : i32
    %c0_i32_0 = arith.constant 0 : i32
    %c0_i32_1 = arith.constant 0 : i32
    return %arg0, %c0_i32, %c0_i32_0 : i32, i32, i32
  }
  func.func @transform_1(%arg0: i32, %arg1: i32) -> (i32, i32) {
    %c0_i32 = arith.constant 0 : i32
    %c0_i32_0 = arith.constant 0 : i32
    return %arg0, %c0_i32 : i32, i32
  }
  func.func @transform_2(%arg0: i32, %arg1: i32) -> (i32, i32) {
    %c0_i32 = arith.constant 0 : i32
    %c0_i32_0 = arith.constant 0 : i32
    return %c0_i32, %arg1 : i32, i32
  }
  func.func @transform_3(%arg0: i32, %arg1: i32) -> (i32, i32) {
    %c0_i32 = arith.constant 0 : i32
    %c0_i32_0 = arith.constant 0 : i32
    return %c0_i32, %arg1 : i32, i32
  }
  func.func @transform_4(%arg0: i32, %arg1: i32) -> (i32, i32) {
    %c0_i32 = arith.constant 0 : i32
    return %arg0, %arg1 : i32, i32
  }
}

</mosaic_0001>

<bundles_post_ra>
// kernel: tpu_custom_call.1
= control target key start
LH: loop header
LB: loop body
LE: loop exit
PB: predicated region body
PF: predicated region fallthrough
CT: control target
= control target key end

     0   :  { %9 = vsyncpa [#allocation3], 0  ;;  %s398_s0 = inlined_call_operand.hbm [shape: f32[2,8,32], index: 0, kind: input, shape index: {}]   ;;  %s399_s1 = inlined_call_operand.vmem [shape: f32[2,32], index: 1, kind: input, shape index: {}]   ;;  %s400_s2 = inlined_call_operand.hbm [shape: bf16[32,128], index: 2, kind: input, shape index: {}]   ;;  %s401_s3 = inlined_call_operand.vmem [shape: f32[2,128], index: 3, kind: input, shape index: {}]   ;;  %s402_s4 = inlined_call_operand.hbm [shape: f32[2,128], index: 4, kind: output, shape index: {}]  }
   0x1   :  { %10 = vsyncpa [#allocation6], 0 }
   0x2   :  { %11 = vsyncpa [#allocation4], 0  ;;  %s321_s15 = smov [#allocation2]   ;;  %s249_s19 = scalar_lea.hbm %s398_s0, 256 }
   0x3   :  { %s17_s16 = sshll.u32 %s321_s15, 4  ;;  %p250_p0 = scmp.ne.s32.totalorder %s398_s0, %s249_s19  ;;  %s18_s16 = int_to_ptr.vmem [resolvable:$true] %s17_s16 }
   0x4   :  { %p253_p1 = scmp.lt.u32.totalorder %s249_s19, %s398_s0 }
   0x6   :  { %p255_p2 = pnand %p253_p1, %p250_p0 }
   0x8   :  { %258 = shalt.err (!%p255_p2)
}
   0x9   :  { %s259_s24 = scalar_lea.vmem %s18_s16, 256  ;;  %p264_p4 = scmp.lt.s32.totalorder %s18_s16, %s18_s16 }
   0xa   :  { %p260_p3 = scmp.ne.s32.totalorder %s18_s16, %s259_s24  ;;  %p265_p5 = scmp.lt.s32.totalorder %s259_s24, %s259_s24 }
   0xc   :  { %p266_p6 = por %p265_p5, %p264_p4 }
   0xe   :  { %p267_p7 = pnand %p266_p6, %p260_p3 }
  0x10   :  { %270 = shalt.err (!%p267_p7)
}
  0x11   :  { %s322_s25 = smov 128   ;;  %s323_s26 = smov 8  }
  0x12   :  { %23 = dma.hbm_to_vmem [thread:$0]  %s398_s0, 256, %s18_s16, [#allocation3], %s322_s25, %s322_s25, %s323_s26  }
  0x13   :  { %s324_s29 = smov [#allocation5]   ;;  %s271_s7 = scalar_lea.hbm %s400_s2, 256 }
  0x14   :  { %s31_s30 = sshll.u32 %s324_s29, 4  ;;  %p272_p8 = scmp.ne.s32.totalorder %s400_s2, %s271_s7  ;;  %s32_s30 = int_to_ptr.vmem [resolvable:$true] %s31_s30 }
  0x15   :  { %p275_p9 = scmp.lt.u32.totalorder %s271_s7, %s400_s2 }
  0x17   :  { %p277_p10 = pnand %p275_p9, %p272_p8 }
  0x19   :  { %280 = shalt.err (!%p277_p10)
}
  0x1a   :  { %s281_s12 = scalar_lea.vmem %s32_s30, 256  ;;  %p286_p12 = scmp.lt.s32.totalorder %s32_s30, %s32_s30 }
  0x1b   :  { %p282_p11 = scmp.ne.s32.totalorder %s32_s30, %s281_s12  ;;  %p287_p13 = scmp.lt.s32.totalorder %s281_s12, %s281_s12 }
  0x1d   :  { %p288_p0 = por %p287_p13, %p286_p12 }
  0x1f   :  { %p289_p1 = pnand %p288_p0, %p282_p11 }
  0x21   :  { %292 = shalt.err (!%p289_p1)
}
  0x22   :  { %s325_s0 = smov 64   ;;  %s326_s13 = smov 4  }
  0x23   :  { %37 = dma.hbm_to_vmem [thread:$0]  %s400_s2, 256, %s32_s30, [#allocation6], %s325_s0, %s325_s0, %s326_s13  }
  0x24   :  { %315 = dma.done.wait [#allocation3], 256  }
  0x25   :  { %316 = vsyncadd [#allocation3], 4294967040 }
  0x26   :  { %317 = dma.done.wait [#allocation6], 256  }
  0x27   :  { %318 = vsyncadd [#allocation6], 4294967040  ;;  %v62_v0 = vlaneseq  ;;  %v327_v1 = vmov 0.0   ;;  %vm328_vm0 = vmmov 0   ;;  %v329_v2 = vmov 1966171168  }
  0x28   :  { %221 = vmatprep.subr.bf16.mxu0 %v327_v1  ;;  %225 = vmatprep.mubr.msk.bf16.mxu0 %vm328_vm0, %v327_v1  ;;  %v60_v3 = vunpack.c.l.s4 %v329_v2  ;;  %v239_v7 = vld [vmem:[#allocation5] sm:$0xff]   ;;  %v240_v9 = vld [vmem:[#allocation5 + $0x8] sm:$0xff]   ;;  %v210_v10 = vld.sshfl [vmem:[%s399_s1] sm:$0x11 pattern:$0x75316420] }
  0x29   :  { %v63_v4 = vshrl.u32 %v62_v0, 7  ;;  %222 = vmatpush3.bf16.msra.mxu0 %v239_v7  ;;  %v58_v11 = vcombine.high %v210_v10, %v210_v10  ;;  %v47_v13 = vld [vmem:[#allocation2] sm:$0xff]  ;;  %v48_v16 = vld [vmem:[#allocation2 + $0x8] sm:$0xff]  ;;  %vm108_vm1 = vcmask 261120   ;;  %vm184_vm2 = vcmask 1041409   ;;  %s330_s18 = smov [#allocation7]  }
  0x2a   :  { %v61_v5 = vunpack.c.0.s8 %v60_v3  ;;  %223 = vmatprep.subr.bf16.mxu0 %v327_v1  ;;  %v177_v43 = vld [vmem:[%s401_s3] sm:$0x3]  ;;  %s200_s19 = sshll.u32 %s330_s18, 4  ;;  %s201_s19 = int_to_ptr.vmem [resolvable:$true] %s200_s19 }
  0x2b   :  { %v75_v8 = vsub.s32 0, %v63_v4  ;;  %v190_v44 = vsub.s32 1, %v63_v4  ;;  %s293_s20 = scalar_lea.vmem %s201_s19, 32  ;;  %p298_p3 = scmp.lt.s32.totalorder %s201_s19, %s201_s19 }
  0x2c   :  { %v64_v6 = vsub.s32 %v61_v5, %v63_v4  ;;  %p294_p2 = scmp.ne.s32.totalorder %s201_s19, %s293_s20  ;;  %p299_p4 = scmp.lt.s32.totalorder %s293_s20, %s293_s20 }
  0x2d   :  { %224 = vmatpush3.bf16.msra.mxu0 %v240_v9  ;;  %v181_v45 = vrot.slane %v177_v43, %v75_v8  ;;  %v191_v48 = vrot.slane %v177_v43, %v190_v44 }
  0x2e   :  { %v65_v12 = vrot.slane %v210_v10, %v64_v6  ;;  %v72_v14 = vrot.slane %v58_v11, %v64_v6  ;;  %p300_p5 = por %p299_p4, %p298_p3 }
  0x30   :  { %v76_v15 = vrot.slane %v65_v12, %v75_v8  ;;  %v80_v17 = vrot.slane %v72_v14, %v75_v8  ;;  %p301_p6 = pnand %p300_p5, %p294_p2 }
  0x32   :  { %v83_v18 = vmul.f32 %v76_v15, %v47_v13  ;;  %v84_v19 = vmul.f32 %v80_v17, %v48_v16 }
  0x34   :  { %v217_v20 = vpack.c.bf16 %v84_v19, %v83_v18 }
  0x36   :  { %226 = vmatmul.mubr.msk.bf16.vlgmr.msra.gmra.mrb[0].mxu0 %vm108_vm1, %v217_v20 }
 0x109   :  { %v146_v21 = vpop.f32.mrb[0].mxu0 }
 0x10a   :  { %v153_v22 = vrot.slane %v146_v21, 4  ;;  %v227_v23 = vpop.f32.mrb[1].mxu0 }
 0x10b   :  { %v149_v24 = vpop.f32.mrb[2].mxu0 }
 0x10c   :  { %v154_v25 = vmax.f32 %v146_v21, %v153_v22  ;;  %v159_v26 = vrot.slane %v149_v24, 4  ;;  %v228_v27 = vpop.f32.mrb[3].mxu0 }
 0x10e   :  { %v155_v28 = vrot.slane %v154_v25, 2  ;;  %v160_v29 = vmax.f32 %v149_v24, %v159_v26 }
 0x110   :  { %v156_v30 = vmax.f32 %v154_v25, %v155_v28  ;;  %v161_v31 = vrot.slane %v160_v29, 2 }
 0x112   :  { %v157_v32 = vrot.slane %v156_v30, 1  ;;  %v162_v33 = vmax.f32 %v160_v29, %v161_v31 }
 0x114   :  { %v158_v34 = vmax.f32 %v156_v30, %v157_v32  ;;  %v163_v35 = vrot.slane %v162_v33, 1 }
 0x116   :  { %v215_v36 = vmul.f32 -1.442695, %v158_v34  ;;  %v164_v37 = vmax.f32 %v162_v33, %v163_v35 }
 0x118   :  { %241 = vpow2.f32 %v215_v36  ;;  %v216_v38 = vmul.f32 -1.442695, %v164_v37 }
 0x11a   :  { %243 = vpow2.f32 %v216_v38 }
 0x122   :  { %v242_v39 = vpop.eup %241 }
 0x123   :  { %v171_v40 = vadd.f32 1.0, %v242_v39 }
 0x124   :  { %v244_v41 = vpop.eup %243 }
 0x125   :  { %v172_v42 = vadd.f32 1.0, %v244_v41  ;;  %245 = vrcp.f32 %v171_v40 }
 0x127   :  { %247 = vrcp.f32 %v172_v42 }
 0x12f   :  { %v246_v46 = vpop.eup %245 }
 0x131   :  { %v248_v47 = vpop.eup %247 }
 0x132   :  { %v185_v49 = vsel %vm184_vm2, %v248_v47, %v246_v46 }
 0x133   :  { %v187_v50 = vmul.f32 %v185_v49, %v181_v45 }
 0x135   :  { %v192_v51 = vadd.f32 %v191_v48, %v187_v50 }
 0x137   :  { %193 = vst [vmem:[#allocation7] sm:$0x3] %v192_v51 }
 0x138   :  { %304 = shalt.err (!%p301_p6)
}
 0x139   :  { %s305_s22 = scalar_lea.hbm %s402_s4, 32 }
 0x13a   :  { %p306_p7 = scmp.ne.s32.totalorder %s402_s4, %s305_s22  ;;  %p309_p8 = scmp.lt.u32.totalorder %s305_s22, %s402_s4 }
 0x13c   :  { %p311_p9 = pnand %p309_p8, %p306_p7 }
 0x13e   :  { %314 = shalt.err (!%p311_p9)
}
 0x13f   :  { %203 = dma.vmem_to_hbm [thread:$0]  %s201_s19, 32, %s402_s4, [#allocation4]  }
 0x140   :  { %319 = dma.done.wait [#allocation4], 32  }
 0x141   :  { %320 = vsyncadd [#allocation4], 4294967264 }
 0x142   :  { %207 = vsyncpa [#allocation3], 1 }
 0x143   :  { %208 = vsyncpa [#allocation6], 1 }
 0x144   :  { %209 = vsyncpa [#allocation4], 1 }

</bundles_post_ra>
